<compile_context>
chip_gen: v7x
topology: tpu7x:2x2x1
jax: 0.10.0
libtpu: 0.0.40
codegen_flags: <defaults>
</compile_context>

<pallas_src>
import functools

import jax
import jax.numpy as jnp
import numpy as np
from jax.experimental import pallas as pl
from jax.experimental.pallas import tpu as pltpu


# ---------------------------------------------------------------------------
# Helpers
# ---------------------------------------------------------------------------
def _round_up(x, m):
    return ((x + m - 1) // m) * m


_VMEM_BUDGET_BYTES = 24 * 1024 * 1024   # safe under v7x's 64-MiB physical VMEM


def _choose_tm(M, K, N, in_itemsize, out_itemsize):
    """Large cdiv-style M tile: a multiple of 256 (full MXU rows on v6e/v7x),
    capped by the VMEM budget, and small enough that grid_m >= 2 when there is
    enough work (v7x has 2 TensorCores sharing the 'parallel' M axis)."""
    if M <= 256:
        return M                                   # tiny problem: one tile

    def working_set(t):
        return (2 * t * K * in_itemsize            # double-buffered patch tiles
                + 2 * t * N * out_itemsize         # double-buffered out tiles
                + K * N * in_itemsize              # resident (single-buffered) weight
                + N * 4)                           # bias

    tm = 2048
    while tm > 256 and working_set(tm) > _VMEM_BUDGET_BYTES:
        tm -= 256
    # Keep at least two grid steps so both v7x TensorCores get work.
    tm = min(tm, _round_up(pl.cdiv(M, 2), 256))
    return max(tm, 256)


# ---------------------------------------------------------------------------
# Kernel
# ---------------------------------------------------------------------------
def _patch_embed_kernel(x_ref, w_ref, b_ref, o_ref):
    # x_ref: (tm, K)  bf16 patch tile
    # w_ref: (K, N)   bf16 projection weight (resident across all M tiles)
    # b_ref: (1, N)   f32 bias
    # o_ref: (tm, N)  output tile
    acc = jnp.dot(x_ref[...], w_ref[...], preferred_element_type=jnp.float32)
    # Epilogue in f32 (v5e VPU has no bf16), single cast at the end.
    o_ref[...] = (acc + b_ref[...]).astype(o_ref.dtype)


def patch_embed_matmul(patches, weight_t, bias, *, out_dtype, tm=None):
    """patches: (M, K) bf16, weight_t: (K, N) bf16, bias: (N,) f32 -> (M, N)."""
    M, K = patches.shape
    K2, N = weight_t.shape
    assert K == K2, (K, K2)
    in_itemsize = patches.dtype.itemsize
    out_itemsize = np.dtype(out_dtype).itemsize

    if tm is None:
        tm = _choose_tm(M, K, N, in_itemsize, out_itemsize)
    tm = min(tm, M)
    if tm < M:
        tm = min(_round_up(tm, 8), M)              # sublane-aligned partial tiles
    grid_m = pl.cdiv(M, tm)                        # ragged last tile is masked

    bias2d = bias.reshape(1, N).astype(jnp.float32)

    cost = pl.CostEstimate(
        flops=2 * M * K * N,
        transcendentals=0,
        bytes_accessed=(M * K * in_itemsize        # patches read once
                        + K * N * in_itemsize      # weight read once
                        + N * 4                    # bias
                        + M * N * out_itemsize),   # output written once
    )

    return pl.pallas_call(
        _patch_embed_kernel,
        out_shape=jax.ShapeDtypeStruct((M, N), out_dtype),
        grid_spec=pltpu.PrefetchScalarGridSpec(
            num_scalar_prefetch=0,
            grid=(grid_m,),
            in_specs=[
                # patches: tiled over M, default double-buffered pipeline.
                pl.BlockSpec((tm, K), lambda i: (i, 0)),
                # weight / bias: constant index_map -> fetched once; single
                # buffer to free K*N*2 bytes of VMEM for bigger M tiles.
                pl.BlockSpec((K, N), lambda i: (0, 0),
                             pipeline_mode=pl.Buffered(buffer_count=1)),
                pl.BlockSpec((1, N), lambda i: (0, 0),
                             pipeline_mode=pl.Buffered(buffer_count=1)),
            ],
            out_specs=pl.BlockSpec((tm, N), lambda i: (i, 0)),
        ),
        compiler_params=pltpu.CompilerParams(
            dimension_semantics=("parallel",),
            vmem_limit_bytes=32 * 1024 * 1024,
        ),
        cost_estimate=cost,
    )(patches, weight_t, bias2d)


# ---------------------------------------------------------------------------
# Parameter prep (run ONCE at init, outside the jitted forward)
# ---------------------------------------------------------------------------
def prepare_patch_embed_params(weight, bias, compute_dtype=jnp.bfloat16):
    """Conv2d weight (E, C, p, p), bias (E,) -> K-major bf16 weight
    (K_pad, N_pad) and f32 bias (N_pad,), with K and N zero-padded to
    multiples of 128 (lane-dense x loads / output stores, no ragged MXU
    contraction pass)."""
    E, C, p, _ = weight.shape
    K = C * p * p
    w_t = weight.reshape(E, K).T.astype(compute_dtype)   # (K, E); K in (c, kh, kw) order
    b = bias.astype(jnp.float32)
    k_pad = _round_up(K, 128)
    n_pad = _round_up(E, 128)
    w_t = jnp.pad(w_t, ((0, k_pad - K), (0, n_pad - E)))
    b = jnp.pad(b, (0, n_pad - E))
    return w_t, b


# ---------------------------------------------------------------------------
# Forward
# ---------------------------------------------------------------------------
@functools.partial(
    jax.jit,
    static_argnames=("patch_size", "embed_dim", "out_dtype", "tm", "keep_padded"))
def patch_embedding_forward(x, w_t, bias_padded, *, patch_size, embed_dim,
                            out_dtype=jnp.bfloat16, tm=None, keep_padded=False):
    """
    x:            (B, C, H, W)     NCHW, like the PyTorch module
    w_t:          (K_pad, N_pad)   prepared bf16 weight (see prepare_*)
    bias_padded:  (N_pad,)         prepared f32 bias
    returns       (B, n_patches, embed_dim)  [(B, n_patches, N_pad) if keep_padded]

    out_dtype defaults to bf16 (halves output HBM / VMEM / store traffic);
    pass jnp.float32 for torch-identical output dtype.
    """
    B, C, H, W = x.shape
    p = patch_size
    gh, gw = H // p, W // p
    n_patches = gh * gw
    K = C * p * p
    K_pad, N_pad = w_t.shape
    compute_dtype = w_t.dtype

    # NCHW -> (B*n_patches, K) im2col.  Cast first so the layout shuffle moves
    # half the bytes; the K zero-pad fuses into the same XLA copy.
    # TODO(synk): fuse this reorder into the kernel DMA (grid over (B, gh),
    # (1, C, p, W) x blocks) to drop this extra bf16 activation HBM pass.
    xp = x.astype(compute_dtype).reshape(B, C, gh, p, gw, p)
    xp = jnp.transpose(xp, (0, 2, 4, 1, 3, 5))            # (B, gh, gw, C, p, p)
    patches = xp.reshape(B * n_patches, K)
    if K_pad != K:
        patches = jnp.pad(patches, ((0, 0), (0, K_pad - K)))

    out = patch_embed_matmul(patches, w_t, bias_padded,
                             out_dtype=out_dtype, tm=tm)   # (B*n_patches, N_pad)

    if keep_padded:
        # Downstream ops (pos-embed add, LayerNorm, ...) can carry the zero
        # tail; skips an extra (M, N_pad) HBM pass when E % 128 != 0.
        return out.reshape(B, n_patches, N_pad)
    return out[:, :embed_dim].reshape(B, n_patches, embed_dim)


# ---------------------------------------------------------------------------
# Self-test
# ---------------------------------------------------------------------------
if __name__ == "__main__":
    # Small, module-consistent shapes: img_size=16, patch_size=4, in_chans=4,
    # embed_dim=32 -> n_patches = 16, M = B*n_patches = 32, K = 64 (pad -> 128).
    B, C, IMG, P, E = 2, 4, 16, 4, 32

    key = jax.random.PRNGKey(0)
    kx, kw, kb = jax.random.split(key, 3)
    x = jax.random.normal(kx, (B, C, IMG, IMG), dtype=jnp.float32)
    weight = jax.random.normal(kw, (E, C, P, P), dtype=jnp.float32) * 0.02
    bias = jax.random.normal(kb, (E,), dtype=jnp.float32) * 0.02

    w_t, b_pad = prepare_patch_embed_params(weight, bias)

    # Default path (auto tile, bf16 out), a forced multi-step ragged-free grid
    # (tm=8 -> 4 steps), an f32-output path, and the keep_padded path.
    out_bf16 = patch_embedding_forward(x, w_t, b_pad, patch_size=P, embed_dim=E)
    out_tiled = patch_embedding_forward(x, w_t, b_pad, patch_size=P, embed_dim=E, tm=8)
    out_f32 = patch_embedding_forward(x, w_t, b_pad, patch_size=P, embed_dim=E,
                                      out_dtype=jnp.float32)
    out_pad = patch_embedding_forward(x, w_t, b_pad, patch_size=P, embed_dim=E,
                                      keep_padded=True)
    jax.block_until_ready((out_bf16, out_tiled, out_f32, out_pad))

    n_patches = (IMG // P) ** 2
    assert out_bf16.shape == (B, n_patches, E), out_bf16.shape
    assert out_bf16.dtype == jnp.bfloat16
    assert out_tiled.shape == out_bf16.shape
    assert out_f32.shape == (B, n_patches, E) and out_f32.dtype == jnp.float32
    assert out_pad.shape == (B, n_patches, 128)

    # Reference: lax conv (same semantics as nn.Conv2d stride=p).  Inputs are
    # rounded through bf16 to match the kernel's bf16 MXU / f32-accumulate path.
    xr = x.astype(jnp.bfloat16).astype(jnp.float32)
    wr = weight.astype(jnp.bfloat16).astype(jnp.float32)
    ref = jax.lax.conv_general_dilated(
        xr, wr, window_strides=(P, P), padding="VALID",
        dimension_numbers=("NCHW", "OIHW", "NCHW"))
    ref = ref + bias[None, :, None, None]
    ref = ref.reshape(B, E, -1).transpose(0, 2, 1)

    def check(o, atol):
        o = jnp.asarray(o, jnp.float32)
        err = float(jnp.max(jnp.abs(o - ref)))
        assert jnp.allclose(o, ref, atol=atol, rtol=atol), err

    check(out_f32, 2e-3)           # f32 output path
    check(out_bf16, 2e-2)          # bf16 output path
    check(out_tiled, 2e-2)         # multi-step grid path
    check(out_pad[..., :E], 2e-2)  # padded-width path
    assert bool(jnp.all(out_pad[..., E:] == 0))

    print("KERNEL_OK")
</pallas_src>

<mosaic_0001>
module attributes {stable_mosaic.version = 11 : i64} {
  func.func @_patch_embed_kernel(%arg0: i32, %arg1: memref<32x128xbf16, #tpu.memory_space<vmem>>, %arg2: memref<128x128xbf16, #tpu.memory_space<vmem>>, %arg3: memref<1x128xf32, #tpu.memory_space<vmem>>, %arg4: memref<32x128xbf16, #tpu.memory_space<vmem>>) attributes {dimension_semantics = [#tpu.dimension_semantics<parallel>], iteration_bounds = array<i64: 1>, scalar_prefetch = 0 : i64, scratch_operands = 0 : i64, tpu.core_type = #tpu.core_type<tc>, window_params = [{transform_indices = @transform_0, window_bounds = array<i64: 32, 128>}, {pipeline_mode = #tpu.pipeline_mode<synchronous>, transform_indices = @transform_1, window_bounds = array<i64: 128, 128>}, {pipeline_mode = #tpu.pipeline_mode<synchronous>, transform_indices = @transform_2, window_bounds = array<i64: 1, 128>}, {transform_indices = @transform_3, window_bounds = array<i64: 32, 128>}]} {
    %c0 = arith.constant 0 : index
    %c0_0 = arith.constant 0 : index
    %0 = vector.load %arg1[%c0, %c0_0] : memref<32x128xbf16, #tpu.memory_space<vmem>>, vector<32x128xbf16>
    %c0_1 = arith.constant 0 : index
    %c0_2 = arith.constant 0 : index
    %1 = vector.load %arg2[%c0_1, %c0_2] : memref<128x128xbf16, #tpu.memory_space<vmem>>, vector<128x128xbf16>
    %cst = arith.constant dense<0.000000e+00> : vector<32x128xf32>
    %2 = tpu.matmul %0, %1, %cst {dimension_numbers = #tpu.dot_dimension_numbers<[1], [0], [0], [1], [0, 0, 1, 1], [], []>} : vector<32x128xbf16>, vector<128x128xbf16>, vector<32x128xf32> -> vector<32x128xf32>
    %c0_3 = arith.constant 0 : index
    %c0_4 = arith.constant 0 : index
    %3 = vector.load %arg3[%c0_3, %c0_4] : memref<1x128xf32, #tpu.memory_space<vmem>>, vector<1x128xf32>
    %4 = vector.broadcast %3 : vector<1x128xf32> to vector<32x128xf32>
    %5 = arith.addf %2, %4 : vector<32x128xf32>
    %6 = arith.truncf %5 : vector<32x128xf32> to vector<32x128xbf16>
    %c0_5 = arith.constant 0 : index
    %c0_6 = arith.constant 0 : index
    %7 = vector.load %arg4[%c0_5, %c0_6] : memref<32x128xbf16, #tpu.memory_space<vmem>>, vector<32x128xbf16>
    tpu.vector_store %arg4[%c0_5, %c0_6], %6 {strides = array<i32>} : memref<32x128xbf16, #tpu.memory_space<vmem>>, vector<32x128xbf16>,
    return
  }
  func.func @transform_0(%arg0: i32) -> (i32, i32) {
    %c0_i32 = arith.constant 0 : i32
    %c0_i32_0 = arith.constant 0 : i32
    return %arg0, %c0_i32 : i32, i32
  }
  func.func @transform_1(%arg0: i32) -> (i32, i32) {
    %c0_i32 = arith.constant 0 : i32
    %c0_i32_0 = arith.constant 0 : i32
    %c0_i32_1 = arith.constant 0 : i32
    return %c0_i32, %c0_i32_0 : i32, i32
  }
  func.func @transform_2(%arg0: i32) -> (i32, i32) {
    %c0_i32 = arith.constant 0 : i32
    %c0_i32_0 = arith.constant 0 : i32
    %c0_i32_1 = arith.constant 0 : i32
    return %c0_i32, %c0_i32_0 : i32, i32
  }
  func.func @transform_3(%arg0: i32) -> (i32, i32) {
    %c0_i32 = arith.constant 0 : i32
    %c0_i32_0 = arith.constant 0 : i32
    return %arg0, %c0_i32 : i32, i32
  }
}

</mosaic_0001>

<bundles_post_ra>
// kernel: patch_embedding_forward.1
= control target key start
LH: loop header
LB: loop body
LE: loop exit
PB: predicated region body
PF: predicated region fallthrough
CT: control target
= control target key end

     0   :  { %s353_s0 = inlined_call_operand.vmem [shape: bf16[32,128], index: 0, kind: input, shape index: {}]   ;;  %s354_s1 = inlined_call_operand.vmem [shape: bf16[128,128], index: 1, kind: input, shape index: {}]   ;;  %s355_s2 = inlined_call_operand.vmem [shape: f32[1,128], index: 2, kind: input, shape index: {}]   ;;  %s356_s3 = inlined_call_operand.hbm [shape: bf16[32,128], index: 3, kind: output, shape index: {}]  }
   0x1   :  { %v251_v0 = vld [vmem:[%s354_s1] sm:$0xff]   ;;  %v252_v1 = vld [vmem:[%s354_s1 + $0x8] sm:$0xff]   ;;  %v253_v2 = vld [vmem:[%s354_s1 + $0x10] sm:$0xff]  }
   0x2   :  { %228 = vmatprep.subr.bf16.mxu0 %v251_v0  ;;  %v254_v3 = vld [vmem:[%s354_s1 + $0x18] sm:$0xff]   ;;  %v259_v4 = vld [vmem:[%s353_s0] sm:$0xff]  }
   0x3   :  { %229 = vmatpush3.bf16.msra.mxu0 %v251_v0  ;;  %244 = vmatprep.mubr.bf16.mxu0 %v259_v4 }
   0x4   :  { %230 = vmatprep.subr.bf16.mxu0 %v252_v1 }
   0x7   :  { %231 = vmatpush3.bf16.msra.mxu0 %v252_v1 }
   0x8   :  { %232 = vmatprep.subr.bf16.mxu0 %v253_v2 }
   0x9   :  { %8 = vsyncpa [#allocation3], 0  ;;  %v255_v5 = vld [vmem:[%s354_s1 + $0x20] sm:$0xff]   ;;  %v256_v6 = vld [vmem:[%s354_s1 + $0x28] sm:$0xff]   ;;  %s285_s7 = smov [#allocation2]  }
   0xa   :  { %v257_v7 = vld [vmem:[%s354_s1 + $0x30] sm:$0xff]   ;;  %v258_v8 = vld [vmem:[%s354_s1 + $0x38] sm:$0xff]   ;;  %v260_v9 = vld [vmem:[%s353_s0 + $0x8] sm:$0xff]   ;;  %s177_s8 = sshll.u32 %s285_s7, 4  ;;  %s178_s8 = int_to_ptr.vmem [resolvable:$true] %s177_s8 }
   0xb   :  { %233 = vmatpush3.bf16.msra.mxu0 %v253_v2  ;;  %v188_v11 = vld [vmem:[%s355_s2] ss:$0 sm:$0xff]  ;;  %s261_s0 = scalar_lea.vmem %s178_s8, 256  ;;  %p266_p1 = scmp.lt.s32.totalorder %s178_s8, %s178_s8 }
   0xc   :  { %234 = vmatprep.subr.bf16.mxu0 %v254_v3  ;;  %p262_p0 = scmp.ne.s32.totalorder %s178_s8, %s261_s0  ;;  %p267_p2 = scmp.lt.s32.totalorder %s261_s0, %s261_s0 }
   0xe   :  { %p268_p3 = por %p267_p2, %p266_p1 }
   0xf   :  { %235 = vmatpush3.bf16.msra.mxu0 %v254_v3 }
  0x10   :  { %236 = vmatprep.subr.bf16.mxu0 %v255_v5  ;;  %p269_p4 = pnand %p268_p3, %p262_p0 }
  0x13   :  { %237 = vmatpush3.bf16.msra.mxu0 %v255_v5 }
  0x14   :  { %238 = vmatprep.subr.bf16.mxu0 %v256_v6 }
  0x17   :  { %239 = vmatpush3.bf16.msra.mxu0 %v256_v6 }
  0x18   :  { %240 = vmatprep.subr.bf16.mxu0 %v257_v7 }
  0x1b   :  { %241 = vmatpush3.bf16.msra.mxu0 %v257_v7 }
  0x1c   :  { %242 = vmatprep.subr.bf16.mxu0 %v258_v8 }
  0x1f   :  { %243 = vmatpush3.bf16.msra.mxu0 %v258_v8 }
  0x22   :  { %245 = vmatmul.mubr.bf16.vlgmr.msra.gmra.mrb[0].mxu0 %v260_v9 }
  0xf5   :  { %v246_v10 = vpop.f32.mrb[0].mxu0 }
  0xf6   :  { %v137_v12 = vpop.f32.mrb[1].mxu0  ;;  %v146_v14 = vadd.f32 %v246_v10, %v188_v11 }
  0xf7   :  { %v247_v13 = vpop.f32.mrb[2].mxu0  ;;  %v138_v17 = vadd.f32 %v188_v11, %v137_v12 }
  0xf8   :  { %v149_v15 = vadd.f32 %v247_v13, %v188_v11  ;;  %v140_v16 = vpop.f32.mrb[3].mxu0 }
  0xf9   :  { %v141_v18 = vadd.f32 %v188_v11, %v140_v16 }
  0xfa   :  { %v215_v19 = vpack.c.bf16 %v149_v15, %v146_v14 }
  0xfb   :  { %v210_v20 = vpack.c.bf16 %v141_v18, %v138_v17 }
  0xfc   :  { %217 = vst [vmem:[#allocation2 + $0x8] sm:$0xff] %v215_v19  }
  0xfd   :  { %211 = vst [vmem:[#allocation2] sm:$0xff] %v210_v20  }
  0xfe   :  { %272 = shalt.err (!%p269_p4)
}
  0xff   :  { %s273_s9 = scalar_lea.hbm %s356_s3, 256 }
 0x100   :  { %p274_p5 = scmp.ne.s32.totalorder %s356_s3, %s273_s9  ;;  %p277_p6 = scmp.lt.u32.totalorder %s273_s9, %s356_s3 }
 0x102   :  { %p279_p7 = pnand %p277_p6, %p274_p5 }
 0x104   :  { %282 = shalt.err (!%p279_p7)
}
 0x105   :  { %s286_s14 = smov 64   ;;  %s287_s15 = smov 4  }
 0x106   :  { %183 = dma.vmem_to_hbm [thread:$0]  %s178_s8, 256, %s356_s3, [#allocation3], %s286_s14, %s286_s14, %s287_s15  }
 0x107   :  { %283 = dma.done.wait [#allocation3], 256  }
 0x108   :  { %284 = vsyncadd [#allocation3], 4294967040 }
 0x109   :  { %187 = vsyncpa [#allocation3], 1 }

</bundles_post_ra>
